<compile_context>
chip_gen: v7x
topology: tpu7x:2x2x1
jax: 0.10.0
libtpu: 0.0.40
codegen_flags: <defaults>
</compile_context>

<pallas_src>
import functools

import jax
import jax.numpy as jnp
from jax import lax
from jax.experimental import pallas as pl
from jax.experimental.pallas import tpu as pltpu


def _reid_loss_kernel(score_ref, feat_ref, lab_row_ref, lab_col_ref, s_y_ref,
                      id_out_ref, metric_out_ref,
                      m_run, l_run, sum_s,
                      *, margin, epsilon, n_rows, n_cols, mask_last):
    t = pl.program_id(0)
    n_t = pl.num_programs(0)

    # ---------------- init running accumulators ----------------
    @pl.when(t == 0)
    def _init():
        m_run[...] = jnp.full(m_run.shape, -1e30, dtype=jnp.float32)
        l_run[...] = jnp.zeros(l_run.shape, dtype=jnp.float32)
        sum_s[...] = jnp.zeros(sum_s.shape, dtype=jnp.float32)

    # ---------------- streamed label-smoothed CE (online softmax) ----------
    # Native-dtype stream (bf16 or f32); compute stays f32.
    s = score_ref[...].astype(jnp.float32)          # [B, TC]
    B, TC = s.shape
    neg_big = jnp.float32(-1e30)
    zero = jnp.float32(0.0)

    def stream(masked):
        if masked:
            col_ids = t * TC + lax.broadcasted_iota(jnp.int32, (B, TC), 1)
            col_valid = col_ids < n_cols            # mask OOB columns
            s_eff = jnp.where(col_valid, s, neg_big)
            s_sum = jnp.sum(jnp.where(col_valid, s, zero),
                            axis=-1, keepdims=True)
        else:
            s_eff = s
            s_sum = jnp.sum(s, axis=-1, keepdims=True)
        m_prev = m_run[...]
        m_new = jnp.maximum(m_prev, jnp.max(s_eff, axis=-1, keepdims=True))
        alpha = jnp.exp(m_prev - m_new)             # rescale previous sum-exp
        p = jnp.exp(s_eff - m_new)                  # masked cols underflow to 0
        l_run[...] = alpha * l_run[...] + jnp.sum(p, axis=-1, keepdims=True)
        m_run[...] = m_new
        sum_s[...] = sum_s[...] + s_sum

    if mask_last:
        @pl.when(t == n_t - 1)
        def _masked():
            stream(True)

        @pl.when(t != n_t - 1)
        def _unmasked():
            stream(False)
    else:
        stream(False)

    # ---------------- finalize: CE reduction + batch-hard triplet ----------
    @pl.when(t == n_t - 1)
    def _finalize():
        inv_b = jnp.float32(1.0 / n_rows)

        # label-smoothed CE:  per_row = lse - (1-eps)*s[y] - (eps/C)*sum(s)
        lse = m_run[...] + jnp.log(l_run[...])                       # [B,1]
        per_row = (lse
                   - (1.0 - epsilon) * s_y_ref[...]
                   - (epsilon / n_cols) * sum_s[...])
        id_out_ref[...] = jnp.sum(per_row, axis=0, keepdims=True) * inv_b

        # batch-hard triplet, mined on squared distances
        f = feat_ref[...].astype(jnp.float32)                        # [B,D]
        f2 = f * f
        sq_row = jnp.sum(f2, axis=-1, keepdims=True)                 # [B,1]
        ones_row = jnp.ones((1, f.shape[1]), jnp.float32)
        sq_col = lax.dot_general(ones_row, f2, (((1,), (1,)), ((), ())),
                                 preferred_element_type=jnp.float32)  # [1,B]
        gram = lax.dot_general(f, f, (((1,), (1,)), ((), ())),
                               preferred_element_type=jnp.float32)    # [B,B]
        dist2 = sq_row + sq_col - 2.0 * gram

        same = lab_row_ref[...] == lab_col_ref[...]                  # [B,B]
        big = jnp.float32(1e30)
        ap2 = jnp.max(jnp.where(same, dist2, -big), axis=-1, keepdims=True)
        an2 = jnp.min(jnp.where(same, big, dist2), axis=-1, keepdims=True)

        # clamp(min=1e-12).sqrt() only on the selected [B,1] vectors.
        d_ap = jnp.sqrt(jnp.maximum(ap2, 1e-12))
        d_an = jnp.sqrt(jnp.maximum(an2, 1e-12))

        per = jnp.maximum(d_ap - d_an + margin, 0.0)                 # hinge
        metric_out_ref[...] = jnp.sum(per, axis=0, keepdims=True) * inv_b


def reid_loss(score, feat, target, *, margin=0.3, epsilon=0.1,
              id_loss_weight=1.0, triplet_loss_weight=1.0, max_tile_c=2048):
    """Returns (ID_LOSS_WEIGHT * id_loss, TRIPLET_LOSS_WEIGHT * triplet_loss)."""
    B, C = score.shape
    _, D = feat.shape
    target = target.astype(jnp.int32)

    # ----- class-tile selection: no pad/copy of score, mask last tile ------
    max_tile_c = max(128, (int(max_tile_c) // 128) * 128)
    itemsize = jnp.dtype(score.dtype).itemsize
    # keep the double-buffered score stream within a few MiB of VMEM
    cap = (8 * 1024 * 1024) // max(1, 2 * B * itemsize)
    cap = max(128, (cap // 128) * 128)
    max_tile_c = min(max_tile_c, cap)

    if C <= max_tile_c:
        tile_c = C                      # full-extent block, single tile
        n_tiles = 1
    else:
        tile_c = max_tile_c             # multiple of 128
        n_tiles = -(-C // tile_c)
    mask_last = (C % tile_c) != 0

    lab_row = target.reshape(B, 1)
    lab_col = target.reshape(1, B)
    # s[y] gathered once on the host side of the kernel (touches B elements).
    s_y = jnp.take_along_axis(score, target.reshape(B, 1),
                              axis=1).astype(jnp.float32)

    kernel = functools.partial(_reid_loss_kernel,
                               margin=float(margin),
                               epsilon=float(epsilon),
                               n_rows=B, n_cols=C,
                               mask_last=mask_last)

    id_loss, metric_loss = pl.pallas_call(
        kernel,
        out_shape=(jax.ShapeDtypeStruct((1, 1), jnp.float32),
                   jax.ShapeDtypeStruct((1, 1), jnp.float32)),
        grid=(n_tiles,),
        in_specs=[
            pl.BlockSpec((B, tile_c), lambda t: (0, t)),   # streamed score
            pl.BlockSpec((B, D), lambda t: (0, 0)),        # resident feat
            pl.BlockSpec((B, 1), lambda t: (0, 0)),        # labels (rows)
            pl.BlockSpec((1, B), lambda t: (0, 0)),        # labels (cols)
            pl.BlockSpec((B, 1), lambda t: (0, 0)),        # s[target]
        ],
        out_specs=(
            pl.BlockSpec((1, 1), lambda t: (0, 0)),
            pl.BlockSpec((1, 1), lambda t: (0, 0)),
        ),
        scratch_shapes=[
            pltpu.VMEM((B, 1), jnp.float32),   # running max
            pltpu.VMEM((B, 1), jnp.float32),   # running sum-exp
            pltpu.VMEM((B, 1), jnp.float32),   # running sum(s)
        ],
        compiler_params=pltpu.CompilerParams(
            dimension_semantics=("arbitrary",),
            vmem_limit_bytes=32 * 1024 * 1024),
    )(score, feat, lab_row, lab_col, s_y)

    return (id_loss_weight * id_loss[0, 0],
            triplet_loss_weight * metric_loss[0, 0])


def _reference(score, feat, target, *, margin=0.3, epsilon=0.1):
    """Plain-JAX reference matching the PyTorch semantics."""
    B, C = score.shape
    logp = jax.nn.log_softmax(score, axis=-1)
    onehot = jax.nn.one_hot(target, C, dtype=jnp.float32)
    tgt = (1.0 - epsilon) * onehot + epsilon / C
    id_loss = jnp.mean(jnp.sum(-tgt * logp, axis=-1))

    sq = jnp.sum(feat * feat, axis=-1)
    dist2 = sq[:, None] + sq[None, :] - 2.0 * feat @ feat.T
    dist = jnp.sqrt(jnp.maximum(dist2, 1e-12))
    same = target[:, None] == target[None, :]
    dist_ap = jnp.max(jnp.where(same, dist, -jnp.inf), axis=-1)
    dist_an = jnp.min(jnp.where(same, jnp.inf, dist), axis=-1)
    tri_loss = jnp.mean(jnp.maximum(dist_ap - dist_an + margin, 0.0))
    return id_loss, tri_loss


if __name__ == "__main__":
    key = jax.random.PRNGKey(0)
    k1, k2, k3, k4, k5, k6 = jax.random.split(key, 6)

    # --- Test 1: typical P x K re-id shapes, single class tile -------------
    B, C, D = 8, 16, 32
    score = jax.random.normal(k1, (B, C), dtype=jnp.float32)
    feat = jax.random.normal(k2, (B, D), dtype=jnp.float32)
    target = jnp.array([0, 0, 1, 1, 2, 2, 3, 3], dtype=jnp.int32)

    id_w, tri_w = reid_loss(score, feat, target)
    jax.block_until_ready((id_w, tri_w))
    ref_id, ref_tri = _reference(score, feat, target)
    assert jnp.allclose(id_w, ref_id, atol=1e-4, rtol=1e-4), (id_w, ref_id)
    assert jnp.allclose(tri_w, ref_tri, atol=1e-4, rtol=1e-4), (tri_w, ref_tri)

    # --- Test 2: B not multiple of 8, C not multiple of tile (masked last) -
    B2, C2, D2 = 6, 200, 48
    score2 = jax.random.normal(k3, (B2, C2), dtype=jnp.float32)
    feat2 = jax.random.normal(k4, (B2, D2), dtype=jnp.float32)
    target2 = jnp.array([0, 0, 1, 1, 2, 2], dtype=jnp.int32)

    id_w2, tri_w2 = reid_loss(score2, feat2, target2, max_tile_c=128)
    jax.block_until_ready((id_w2, tri_w2))
    ref_id2, ref_tri2 = _reference(score2, feat2, target2)
    assert jnp.allclose(id_w2, ref_id2, atol=1e-4, rtol=1e-4), (id_w2, ref_id2)
    assert jnp.allclose(tri_w2, ref_tri2, atol=1e-4, rtol=1e-4), (tri_w2, ref_tri2)

    # --- Test 3: native bf16 logits streamed (cast per tile in-kernel) -----
    B3, C3, D3 = 8, 384, 32
    score3 = jax.random.normal(k5, (B3, C3), dtype=jnp.float32).astype(jnp.bfloat16)
    feat3 = jax.random.normal(k6, (B3, D3), dtype=jnp.float32)
    target3 = jnp.array([0, 0, 1, 1, 2, 2, 3, 3], dtype=jnp.int32)

    id_w3, tri_w3 = reid_loss(score3, feat3, target3, max_tile_c=128)
    jax.block_until_ready((id_w3, tri_w3))
    ref_id3, ref_tri3 = _reference(score3.astype(jnp.float32), feat3, target3)
    assert jnp.allclose(id_w3, ref_id3, atol=1e-4, rtol=1e-4), (id_w3, ref_id3)
    assert jnp.allclose(tri_w3, ref_tri3, atol=1e-4, rtol=1e-4), (tri_w3, ref_tri3)

    print("KERNEL_OK")
</pallas_src>

<mosaic_0001>
module attributes {stable_mosaic.version = 11 : i64} {
  func.func @_reid_loss_kernel(%arg0: i32, %arg1: memref<8x16xf32, #tpu.memory_space<vmem>>, %arg2: memref<8x32xf32, #tpu.memory_space<vmem>>, %arg3: memref<8x1xi32, #tpu.memory_space<vmem>>, %arg4: memref<1x8xi32, #tpu.memory_space<vmem>>, %arg5: memref<8x1xf32, #tpu.memory_space<vmem>>, %arg6: memref<1x1xf32, #tpu.memory_space<vmem>>, %arg7: memref<1x1xf32, #tpu.memory_space<vmem>>, %arg8: memref<8x1xf32, #tpu.memory_space<vmem>>, %arg9: memref<8x1xf32, #tpu.memory_space<vmem>>, %arg10: memref<8x1xf32, #tpu.memory_space<vmem>>) attributes {dimension_semantics = [#tpu.dimension_semantics<arbitrary>], iteration_bounds = array<i64: 1>, scalar_prefetch = 0 : i64, scratch_operands = 3 : i64, tpu.core_type = #tpu.core_type<tc>, window_params = [{transform_indices = @transform_0, window_bounds = array<i64: 8, 16>}, {pipeline_mode = #tpu.pipeline_mode<synchronous>, transform_indices = @transform_1, window_bounds = array<i64: 8, 32>}, {pipeline_mode = #tpu.pipeline_mode<synchronous>, transform_indices = @transform_2, window_bounds = array<i64: 8, 1>}, {pipeline_mode = #tpu.pipeline_mode<synchronous>, transform_indices = @transform_3, window_bounds = array<i64: 1, 8>}, {pipeline_mode = #tpu.pipeline_mode<synchronous>, transform_indices = @transform_4, window_bounds = array<i64: 8, 1>}, {pipeline_mode = #tpu.pipeline_mode<synchronous>, transform_indices = @transform_5, window_bounds = array<i64: 1, 1>}, {pipeline_mode = #tpu.pipeline_mode<synchronous>, transform_indices = @transform_6, window_bounds = array<i64: 1, 1>}]} {
    %c0_i32 = arith.constant 0 : i32
    %0 = arith.cmpi eq, %arg0, %c0_i32 : i32
    %1 = arith.extui %0 : i1 to i32
    %c0_i32_0 = arith.constant 0 : i32
    %2 = arith.cmpi ne, %1, %c0_i32_0 : i32
    scf.if %2 {
      %cst_18 = arith.constant -1.000000e+30 : f32
      %28 = vector.broadcast %cst_18 : f32 to vector<8x1xf32>
      %c0_19 = arith.constant 0 : index
      %c0_20 = arith.constant 0 : index
      %29 = vector.load %arg8[%c0_19, %c0_20] : memref<8x1xf32, #tpu.memory_space<vmem>>, vector<8x1xf32>
      tpu.vector_store %arg8[%c0_19, %c0_20], %28 {strides = array<i32>} : memref<8x1xf32, #tpu.memory_space<vmem>>, vector<8x1xf32>,
      %cst_21 = arith.constant 0.000000e+00 : f32
      %30 = vector.broadcast %cst_21 : f32 to vector<8x1xf32>
      %c0_22 = arith.constant 0 : index
      %c0_23 = arith.constant 0 : index
      %31 = vector.load %arg9[%c0_22, %c0_23] : memref<8x1xf32, #tpu.memory_space<vmem>>, vector<8x1xf32>
      tpu.vector_store %arg9[%c0_22, %c0_23], %30 {strides = array<i32>} : memref<8x1xf32, #tpu.memory_space<vmem>>, vector<8x1xf32>,
      %cst_24 = arith.constant 0.000000e+00 : f32
      %32 = vector.broadcast %cst_24 : f32 to vector<8x1xf32>
      %c0_25 = arith.constant 0 : index
      %c0_26 = arith.constant 0 : index
      %33 = vector.load %arg10[%c0_25, %c0_26] : memref<8x1xf32, #tpu.memory_space<vmem>>, vector<8x1xf32>
      tpu.vector_store %arg10[%c0_25, %c0_26], %32 {strides = array<i32>} : memref<8x1xf32, #tpu.memory_space<vmem>>, vector<8x1xf32>,
    } else {
    }
    %c0 = arith.constant 0 : index
    %c0_1 = arith.constant 0 : index
    %3 = vector.load %arg1[%c0, %c0_1] : memref<8x16xf32, #tpu.memory_space<vmem>>, vector<8x16xf32>
    %cst = arith.constant dense<0.000000e+00> : vector<8xf32>
    %4 = vector.multi_reduction <add>, %3, %cst [1] : vector<8x16xf32> to vector<8xf32>
    %5 = vector.shape_cast %4 : vector<8xf32> to vector<8x1xf32>
    %c0_2 = arith.constant 0 : index
    %c0_3 = arith.constant 0 : index
    %6 = vector.load %arg8[%c0_2, %c0_3] : memref<8x1xf32, #tpu.memory_space<vmem>>, vector<8x1xf32>
    %cst_4 = arith.constant dense<0xFF800000> : vector<8xf32>
    %7 = vector.multi_reduction <maximumf>, %3, %cst_4 [1] : vector<8x16xf32> to vector<8xf32>
    %8 = vector.shape_cast %7 : vector<8xf32> to vector<8x1xf32>
    %9 = arith.maximumf %6, %8 : vector<8x1xf32>
    %10 = arith.subf %6, %9 : vector<8x1xf32>
    %11 = math.exp %10 : vector<8x1xf32>
    %12 = vector.broadcast %9 : vector<8x1xf32> to vector<8x16xf32>
    %13 = arith.subf %3, %12 : vector<8x16xf32>
    %14 = math.exp %13 : vector<8x16xf32>
    %c0_5 = arith.constant 0 : index
    %c0_6 = arith.constant 0 : index
    %15 = vector.load %arg9[%c0_5, %c0_6] : memref<8x1xf32, #tpu.memory_space<vmem>>, vector<8x1xf32>
    %16 = arith.mulf %11, %15 : vector<8x1xf32>
    %cst_7 = arith.constant dense<0.000000e+00> : vector<8xf32>
    %17 = vector.multi_reduction <add>, %14, %cst_7 [1] : vector<8x16xf32> to vector<8xf32>
    %18 = vector.shape_cast %17 : vector<8xf32> to vector<8x1xf32>
    %19 = arith.addf %16, %18 : vector<8x1xf32>
    %c0_8 = arith.constant 0 : index
    %c0_9 = arith.constant 0 : index
    %20 = vector.load %arg9[%c0_8, %c0_9] : memref<8x1xf32, #tpu.memory_space<vmem>>, vector<8x1xf32>
    tpu.vector_store %arg9[%c0_8, %c0_9], %19 {strides = array<i32>} : memref<8x1xf32, #tpu.memory_space<vmem>>, vector<8x1xf32>,
    %c0_10 = arith.constant 0 : index
    %c0_11 = arith.constant 0 : index
    %21 = vector.load %arg8[%c0_10, %c0_11] : memref<8x1xf32, #tpu.memory_space<vmem>>, vector<8x1xf32>
    tpu.vector_store %arg8[%c0_10, %c0_11], %9 {strides = array<i32>} : memref<8x1xf32, #tpu.memory_space<vmem>>, vector<8x1xf32>,
    %c0_12 = arith.constant 0 : index
    %c0_13 = arith.constant 0 : index
    %22 = vector.load %arg10[%c0_12, %c0_13] : memref<8x1xf32, #tpu.memory_space<vmem>>, vector<8x1xf32>
    %23 = arith.addf %22, %5 : vector<8x1xf32>
    %c0_14 = arith.constant 0 : index
    %c0_15 = arith.constant 0 : index
    %24 = vector.load %arg10[%c0_14, %c0_15] : memref<8x1xf32, #tpu.memory_space<vmem>>, vector<8x1xf32>
    tpu.vector_store %arg10[%c0_14, %c0_15], %23 {strides = array<i32>} : memref<8x1xf32, #tpu.memory_space<vmem>>, vector<8x1xf32>,
    %c0_i32_16 = arith.constant 0 : i32
    %25 = arith.cmpi eq, %arg0, %c0_i32_16 : i32
    %26 = arith.extui %25 : i1 to i32
    %c0_i32_17 = arith.constant 0 : i32
    %27 = arith.cmpi ne, %26, %c0_i32_17 : i32
    scf.if %27 {
      %c0_18 = arith.constant 0 : index
      %c0_19 = arith.constant 0 : index
      %28 = vector.load %arg8[%c0_18, %c0_19] : memref<8x1xf32, #tpu.memory_space<vmem>>, vector<8x1xf32>
      %c0_20 = arith.constant 0 : index
      %c0_21 = arith.constant 0 : index
      %29 = vector.load %arg9[%c0_20, %c0_21] : memref<8x1xf32, #tpu.memory_space<vmem>>, vector<8x1xf32>
      %30 = math.log %29 : vector<8x1xf32>
      %31 = arith.addf %28, %30 : vector<8x1xf32>
      %c0_22 = arith.constant 0 : index
      %c0_23 = arith.constant 0 : index
      %32 = vector.load %arg5[%c0_22, %c0_23] : memref<8x1xf32, #tpu.memory_space<vmem>>, vector<8x1xf32>
      %cst_24 = arith.constant 0.899999976 : f32
      %33 = vector.broadcast %cst_24 : f32 to vector<8x1xf32>
      %34 = arith.mulf %33, %32 : vector<8x1xf32>
      %35 = arith.subf %31, %34 : vector<8x1xf32>
      %c0_25 = arith.constant 0 : index
      %c0_26 = arith.constant 0 : index
      %36 = vector.load %arg10[%c0_25, %c0_26] : memref<8x1xf32, #tpu.memory_space<vmem>>, vector<8x1xf32>
      %cst_27 = arith.constant 6.250000e-03 : f32
      %37 = vector.broadcast %cst_27 : f32 to vector<8x1xf32>
      %38 = arith.mulf %37, %36 : vector<8x1xf32>
      %39 = arith.subf %35, %38 : vector<8x1xf32>
      %cst_28 = arith.constant dense<0.000000e+00> : vector<1xf32>
      %40 = vector.multi_reduction <add>, %39, %cst_28 [0] : vector<8x1xf32> to vector<1xf32>
      %41 = vector.shape_cast %40 : vector<1xf32> to vector<1x1xf32>
      %cst_29 = arith.constant 1.250000e-01 : f32
      %42 = vector.broadcast %cst_29 : f32 to vector<1x1xf32>
      %43 = arith.mulf %41, %42 : vector<1x1xf32>
      %c0_30 = arith.constant 0 : index
      %c0_31 = arith.constant 0 : index
      %44 = vector.load %arg6[%c0_30, %c0_31] : memref<1x1xf32, #tpu.memory_space<vmem>>, vector<1x1xf32>
      tpu.vector_store %arg6[%c0_30, %c0_31], %43 {strides = array<i32>} : memref<1x1xf32, #tpu.memory_space<vmem>>, vector<1x1xf32>,
      %c0_32 = arith.constant 0 : index
      %c0_33 = arith.constant 0 : index
      %45 = vector.load %arg2[%c0_32, %c0_33] : memref<8x32xf32, #tpu.memory_space<vmem>>, vector<8x32xf32>
      %46 = arith.mulf %45, %45 : vector<8x32xf32>
      %cst_34 = arith.constant dense<0.000000e+00> : vector<8xf32>
      %47 = vector.multi_reduction <add>, %46, %cst_34 [1] : vector<8x32xf32> to vector<8xf32>
      %48 = vector.shape_cast %47 : vector<8xf32> to vector<8x1xf32>
      %cst_35 = arith.constant 1.000000e+00 : f32
      %49 = vector.broadcast %cst_35 : f32 to vector<1x32xf32>
      %cst_36 = arith.constant dense<0.000000e+00> : vector<1x8xf32>
      %50 = tpu.matmul %49, %46, %cst_36 {dimension_numbers = #tpu.dot_dimension_numbers<[1], [1], [0], [0], [0, 0, 1, 0], [], []>} : vector<1x32xf32>, vector<8x32xf32>, vector<1x8xf32> -> vector<1x8xf32>
      %cst_37 = arith.constant dense<0.000000e+00> : vector<8x8xf32>
      %51 = tpu.matmul %45, %45, %cst_37 {dimension_numbers = #tpu.dot_dimension_numbers<[1], [1], [0], [0], [0, 0, 1, 0], [], []>} : vector<8x32xf32>, vector<8x32xf32>, vector<8x8xf32> -> vector<8x8xf32>
      %52 = vector.broadcast %48 : vector<8x1xf32> to vector<8x8xf32>
      %53 = vector.broadcast %50 : vector<1x8xf32> to vector<8x8xf32>
      %54 = arith.addf %52, %53 : vector<8x8xf32>
      %cst_38 = arith.constant 2.000000e+00 : f32
      %55 = vector.broadcast %cst_38 : f32 to vector<8x8xf32>
      %56 = arith.mulf %55, %51 : vector<8x8xf32>
      %57 = arith.subf %54, %56 : vector<8x8xf32>
      %c0_39 = arith.constant 0 : index
      %c0_40 = arith.constant 0 : index
      %58 = vector.load %arg3[%c0_39, %c0_40] : memref<8x1xi32, #tpu.memory_space<vmem>>, vector<8x1xi32>
      %c0_41 = arith.constant 0 : index
      %c0_42 = arith.constant 0 : index
      %59 = vector.load %arg4[%c0_41, %c0_42] : memref<1x8xi32, #tpu.memory_space<vmem>>, vector<1x8xi32>
      %60 = vector.broadcast %58 : vector<8x1xi32> to vector<8x8xi32>
      %61 = vector.broadcast %59 : vector<1x8xi32> to vector<8x8xi32>
      %62 = arith.cmpi eq, %60, %61 : vector<8x8xi32>
      %cst_43 = arith.constant 0.000000e+00 : f32
      %cst_44 = arith.constant 1.000000e+30 : f32
      %63 = arith.subf %cst_43, %cst_44 : f32
      %64 = vector.broadcast %63 : f32 to vector<8x8xf32>
      %65 = arith.select %62, %57, %64 : vector<8x8xi1>, vector<8x8xf32>
      %cst_45 = arith.constant dense<0xFF800000> : vector<8xf32>
      %66 = vector.multi_reduction <maximumf>, %65, %cst_45 [1] : vector<8x8xf32> to vector<8xf32>
      %67 = vector.shape_cast %66 : vector<8xf32> to vector<8x1xf32>
      %cst_46 = arith.constant 1.000000e+30 : f32
      %68 = vector.broadcast %cst_46 : f32 to vector<8x8xf32>
      %69 = arith.select %62, %68, %57 : vector<8x8xi1>, vector<8x8xf32>
      %cst_47 = arith.constant dense<0x7F800000> : vector<8xf32>
      %70 = vector.multi_reduction <minimumf>, %69, %cst_47 [1] : vector<8x8xf32> to vector<8xf32>
      %71 = vector.shape_cast %70 : vector<8xf32> to vector<8x1xf32>
      %cst_48 = arith.constant 9.99999996E-13 : f32
      %72 = vector.broadcast %cst_48 : f32 to vector<8x1xf32>
      %73 = arith.maximumf %67, %72 : vector<8x1xf32>
      %74 = math.sqrt %73 : vector<8x1xf32>
      %cst_49 = arith.constant 9.99999996E-13 : f32
      %75 = vector.broadcast %cst_49 : f32 to vector<8x1xf32>
      %76 = arith.maximumf %71, %75 : vector<8x1xf32>
      %77 = math.sqrt %76 : vector<8x1xf32>
      %78 = arith.subf %74, %77 : vector<8x1xf32>
      %cst_50 = arith.constant 3.000000e-01 : f32
      %79 = vector.broadcast %cst_50 : f32 to vector<8x1xf32>
      %80 = arith.addf %78, %79 : vector<8x1xf32>
      %cst_51 = arith.constant 0.000000e+00 : f32
      %81 = vector.broadcast %cst_51 : f32 to vector<8x1xf32>
      %82 = arith.maximumf %80, %81 : vector<8x1xf32>
      %cst_52 = arith.constant dense<0.000000e+00> : vector<1xf32>
      %83 = vector.multi_reduction <add>, %82, %cst_52 [0] : vector<8x1xf32> to vector<1xf32>
      %84 = vector.shape_cast %83 : vector<1xf32> to vector<1x1xf32>
      %cst_53 = arith.constant 1.250000e-01 : f32
      %85 = vector.broadcast %cst_53 : f32 to vector<1x1xf32>
      %86 = arith.mulf %84, %85 : vector<1x1xf32>
      %c0_54 = arith.constant 0 : index
      %c0_55 = arith.constant 0 : index
      %87 = vector.load %arg7[%c0_54, %c0_55] : memref<1x1xf32, #tpu.memory_space<vmem>>, vector<1x1xf32>
      tpu.vector_store %arg7[%c0_54, %c0_55], %86 {strides = array<i32>} : memref<1x1xf32, #tpu.memory_space<vmem>>, vector<1x1xf32>,
    } else {
    }
    return
  }
  func.func @transform_0(%arg0: i32) -> (i32, i32) {
    %c0_i32 = arith.constant 0 : i32
    %c0_i32_0 = arith.constant 0 : i32
    return %c0_i32, %arg0 : i32, i32
  }
  func.func @transform_1(%arg0: i32) -> (i32, i32) {
    %c0_i32 = arith.constant 0 : i32
    %c0_i32_0 = arith.constant 0 : i32
    %c0_i32_1 = arith.constant 0 : i32
    return %c0_i32, %c0_i32_0 : i32, i32
  }
  func.func @transform_2(%arg0: i32) -> (i32, i32) {
    %c0_i32 = arith.constant 0 : i32
    %c0_i32_0 = arith.constant 0 : i32
    %c0_i32_1 = arith.constant 0 : i32
    return %c0_i32, %c0_i32_0 : i32, i32
  }
  func.func @transform_3(%arg0: i32) -> (i32, i32) {
    %c0_i32 = arith.constant 0 : i32
    %c0_i32_0 = arith.constant 0 : i32
    %c0_i32_1 = arith.constant 0 : i32
    return %c0_i32, %c0_i32_0 : i32, i32
  }
  func.func @transform_4(%arg0: i32) -> (i32, i32) {
    %c0_i32 = arith.constant 0 : i32
    %c0_i32_0 = arith.constant 0 : i32
    %c0_i32_1 = arith.constant 0 : i32
    return %c0_i32, %c0_i32_0 : i32, i32
  }
  func.func @transform_5(%arg0: i32) -> (i32, i32) {
    %c0_i32 = arith.constant 0 : i32
    %c0_i32_0 = arith.constant 0 : i32
    %c0_i32_1 = arith.constant 0 : i32
    return %c0_i32, %c0_i32_0 : i32, i32
  }
  func.func @transform_6(%arg0: i32) -> (i32, i32) {
    %c0_i32 = arith.constant 0 : i32
    %c0_i32_0 = arith.constant 0 : i32
    %c0_i32_1 = arith.constant 0 : i32
    return %c0_i32, %c0_i32_0 : i32, i32
  }
}

</mosaic_0001>

<bundles_post_ra>
// kernel: tpu_custom_call.1
= control target key start
LH: loop header
LB: loop body
LE: loop exit
PB: predicated region body
PF: predicated region fallthrough
CT: control target
= control target key end

     0   :  { %12 = vsyncpa [#allocation6], 0  ;;  %vm33_vm0 = vcmask 130048   ;;  %vm91_vm1 = vcmask 261120   ;;  %v411_v3 = vmov 0.0   ;;  %s522_s0 = inlined_call_operand.vmem [shape: f32[8,16], index: 0, kind: input, shape index: {}]   ;;  %s523_s1 = inlined_call_operand.vmem [shape: f32[8,32], index: 1, kind: input, shape index: {}]   ;;  %s524_s2 = inlined_call_operand.vmem [shape: s32[8,1], index: 2, kind: input, shape index: {}]   ;;  %s525_s3 = inlined_call_operand.vmem [shape: s32[1,8], index: 3, kind: input, shape index: {}]   ;;  %s526_s4 = inlined_call_operand.vmem [shape: f32[8,1], index: 4, kind: input, shape index: {}]   ;;  %s527_s5 = inlined_call_operand.hbm [shape: f32[1,1], index: 5, kind: output, shape index: {0}]   ;;  %s528_s6 = inlined_call_operand.hbm [shape: f32[1,1], index: 6, kind: output, shape index: {1}]  }
   0x1   :  { %v456_v0 = vld [vmem:[%s522_s0] sm:$0xff]  ;;  %334 = vmatprep.subr.mxu0 %v411_v3  ;;  %339 = vmatprep.subr.mxu1 %v411_v3 }
   0x2   :  { %v89_v1 = vld [vmem:[%s523_s1] sm:$0xff]  ;;  %v38_v2 = vsel %vm33_vm0, %v456_v0, -inf }
   0x3   :  { %v90_v4 = vmul.f32 %v89_v1, %v89_v1 }
   0x4   :  { %13 = vsyncpa [#allocation8], 0  ;;  %39 = vmax.xlane.f32.xlu0 %v38_v2  ;;  %vm412_vm2 = vmmov 0   ;;  %340 = vmatpush3.xpose.msk.msra.mxu1 %vm91_vm1, %v89_v1  ;;  %v413_v6 = vmov 1.0   ;;  %vm28_vm3 = vcmask 7168   ;;  %v415_v8 = vmov 0  }
   0x5   :  { %336 = vmatprep.mubr.msk.f32.mxu0 %vm412_vm2, %v411_v3  ;;  %335 = vmatpush3.xpose.msk.msra.mxu0 %vm91_vm1, %v90_v4  ;;  %v92_v5 = vsel %vm91_vm1, %v90_v4, 0.0  ;;  %v414_v7 = vmov -1e+30   ;;  %30 = vst.msk [vmem:[#allocation3] sm:$0xff] %vm28_vm3, %v411_v3  ;;  %31 = vst.msk [vmem:[#allocation4] sm:$0xff] %vm28_vm3, %v411_v3  ;;  %v251_v9 = vld [vmem:[%s524_s2] sm:$0xff]  ;;  %v244_v14 = vlaneseq }
   0x6   :  { %341 = vmatprep.mubr.msk.f32.mxu1 %vm412_vm2, %v411_v3  ;;  %93 = vadd.xlane.f32.xlu1 %v92_v5  ;;  %29 = vst.msk [vmem:[#allocation2] sm:$0xff] %vm28_vm3, %v414_v7  ;;  %v329_v23 = vld [vmem:[%s525_s3] ss:$0 sm:$0xff]  ;;  %vm262_vm5 = vcmask 64512   ;;  %v34_v37 = vsel %vm33_vm0, %v456_v0, 0.0  ;;  %vm87_vm10 = vcmask 0  }
   0x7   :  { %342 = vmatmul.mubr.msk.f32.vlgmr.msra.gmra.mrb[0].mxu1 %vm91_vm1, %v89_v1  ;;  %351 = vset.pattern.permute.xlu0 %v415_v8  ;;  %v245_v15 = vshrl.u32 %v244_v14, 7  ;;  %v73_v58 = vld [vmem:[%s526_s4] sm:$0xff]  ;;  %s416_s4 = smov [#allocation7]   ;;  %s417_s28 = smov [#allocation5]  }
   0x8   :  { %337 = vmatmul.mubr.msk.f32.vlgmr.msra.gmra.mrb[0].mxu0 %vm91_vm1, %v413_v6  ;;  %352 = vset.pattern.permute.xlu1 %v415_v8  ;;  %v74_v2 = vmul.f32 0.9, %v73_v58  ;;  %s313_s27 = sshll.u32 %s416_s4, 4  ;;  %s303_s29 = sshll.u32 %s417_s28, 4  ;;  %s314_s27 = int_to_ptr.vmem [resolvable:$true] %s313_s27  ;;  %s488_s29 = int_to_ptr.vmem [resolvable:$true] %s303_s29 }
   0x9   :  { %v246_v17 = vsub.s32 0, %v245_v15  ;;  %s363_s30 = scalar_lea.vmem %s314_s27, 16  ;;  %s367_s7 = scalar_lea.vmem %s314_s27, 32 }
   0xa   :  { %p364_p0 = scmp.ne.s32.totalorder %s314_s27, %s363_s30  ;;  %p368_p1 = scmp.lt.s32.totalorder %s314_s27, %s314_s27 }
   0xb   :  { %p369_p2 = scmp.lt.s32.totalorder %s367_s7, %s363_s30 }
   0xc   :  { %v53_v41 = vld [vmem:[#allocation3] sm:$0xff]  ;;  %v62_v48 = vld [vmem:[#allocation4] sm:$0xff] }
   0xd   :  { %v37_v10 = vld [vmem:[#allocation2] sm:$0xff]  ;;  %p370_p3 = por %p369_p2, %p368_p1 }
   0xf   :  { %p371_p4 = pnand %p370_p3, %p364_p0 }
  0x17   :  { %254 = vperm.xlu1 %352, %v251_v9  }
  0x91   :  { %v40_v11 = vpop.xlane.xlu0 %39 }
  0x92   :  { %v41_v12 = vmax.f32 %v37_v10, %v40_v11 }
  0x93   :  { %v94_v16 = vpop.xlane.xlu1 %93 }
  0x94   :  { %v42_v13 = vsub.f32 %v37_v10, %v41_v12  ;;  %61 = vst.msk [vmem:[#allocation2] sm:$0xff] %vm28_vm3, %v41_v12  ;;  %47 = vperm.xlu0 %351, %v41_v12  }
  0x96   :  { %v43_v38 = vmul.f32 1.442695, %v42_v13 }
  0x97   :  { %v255_v18 = vpop.permute.xlu1 %254 }
  0x98   :  { %vm260_vm4 = vcmp.eq.s32.totalorder %v255_v18, %v329_v23 }
  0x9b   :  { %v68_v4 = vld [vmem:[#allocation2] sm:$0xff] }
  0xda   :  { %v240_v20 = vpop.f32.mrb[0].mxu1 }
  0xdb   :  { %v167_v19 = vpop.f32.mrb[0].mxu0  ;;  %v249_v22 = vmul.f32 2.0, %v240_v20  ;;  %v343_v25 = vpop.f32.mrb[1].mxu1 }
  0xdc   :  { %v247_v21 = vrot.slane %v167_v19, %v246_v17  ;;  %v338_v24 = vpop.f32.mrb[1].mxu0 }
  0xde   :  { %v248_v26 = vadd.f32 %v247_v21, %v94_v16 }
  0xe0   :  { %v250_v27 = vsub.f32 %v248_v26, %v249_v22 }
  0xe2   :  { %v261_v28 = vsel %vm260_vm4, %v250_v27, -1e+30  ;;  %v266_v29 = vsel %vm260_vm4, 1e+30, %v250_v27 }
  0xe3   :  { %v263_v30 = vsel %vm262_vm5, %v261_v28, -inf  ;;  %v267_v31 = vsel %vm262_vm5, %v266_v29, inf }
  0xe4   :  { %264 = vmax.xlane.f32.xlu0 %v263_v30 }
 0x113   :  { %v48_v32 = vpop.permute.xlu0 %47 }
 0x114   :  { %v50_v33 = vsub.f32 %v456_v0, %v48_v32 }
 0x116   :  { %v51_v34 = vmul.f32 1.442695, %v50_v33 }
 0x118   :  { %353 = vpow2.f32 %v51_v34 }
 0x119   :  { %355 = vpow2.f32 %v43_v38 }
 0x122   :  { %v354_v35 = vpop.eup %353 }
 0x123   :  { %v55_v36 = vsel %vm33_vm0, %v354_v35, 0.0  ;;  %v356_v40 = vpop.eup %355 }
 0x124   :  { %56 = vadd.xlane.f32.xlu1 %v55_v36  ;;  %v54_v43 = vmul.f32 %v356_v40, %v53_v41 }
 0x128   :  { %268 = vmin.xlane.f32.xlu1 %v267_v31 }
 0x12c   :  { %35 = vadd.xlane.f32.xlu1 %v34_v37 }
 0x171   :  { %v265_v39 = vpop.xlane.xlu0 %264 }
 0x172   :  { %v270_v42 = vmax.f32 %v265_v39, 1e-12 }
 0x174   :  { %357 = vrsqrt.f32 %v270_v42  ;;  %vm273_vm6 = vcmp.eq.f32.partialorder %v270_v42, inf  ;;  %v276_v55 = vand.u32 2147483648, %v270_v42  ;;  %vm275_vm7 = vcmp.eq.f32.partialorder %v270_v42, 0.0 }
 0x17e   :  { %v358_v52 = vpop.eup %357 }
 0x17f   :  { %v272_v53 = vmul.f32 %v358_v52, %v270_v42 }
 0x181   :  { %v274_v57 = vsel %vm273_vm6, %v270_v42, %v272_v53 }
 0x182   :  { %v277_v63 = vsel %vm275_vm7, %v276_v55, %v274_v57 }
 0x1b1   :  { %v57_v44 = vpop.xlane.xlu1 %56 }
 0x1b2   :  { %v58_v45 = vadd.f32 %v57_v44, %v54_v43 }
 0x1b4   :  { %60 = vst.msk [vmem:[#allocation3] sm:$0xff] %vm28_vm3, %v58_v45 }
 0x1b5   :  { %v269_v46 = vpop.xlane.xlu1 %268 }
 0x1b6   :  { %v278_v47 = vmax.f32 %v269_v46, 1e-12 }
 0x1b8   :  { %359 = vrsqrt.f32 %v278_v47  ;;  %vm281_vm8 = vcmp.eq.f32.partialorder %v278_v47, inf  ;;  %v284_v59 = vand.u32 2147483648, %v278_v47  ;;  %vm283_vm9 = vcmp.eq.f32.partialorder %v278_v47, 0.0 }
 0x1b9   :  { %v36_v49 = vpop.xlane.xlu1 %35 }
 0x1ba   :  { %v63_v50 = vadd.f32 %v62_v48, %v36_v49 }
 0x1bb   :  { %v69_v51 = vld [vmem:[#allocation3] sm:$0xff] }
 0x1bc   :  { %64 = vst.msk [vmem:[#allocation4] sm:$0xff] %vm28_vm3, %v63_v50  ;;  %361 = vlog2.f32 %v69_v51 }
 0x1c2   :  { %v360_v54 = vpop.eup %359 }
 0x1c3   :  { %v280_v56 = vmul.f32 %v360_v54, %v278_v47  ;;  %v76_v62 = vld [vmem:[#allocation4] sm:$0xff] }
 0x1c4   :  { %v77_v6 = vmul.f32 0.00625, %v76_v62 }
 0x1c5   :  { %v282_v60 = vsel %vm281_vm8, %v278_v47, %v280_v56 }
 0x1c6   :  { %v362_v61 = vpop.eup %361  ;;  %v285_v0 = vsel %vm283_vm9, %v284_v59, %v282_v60 }
 0x1c7   :  { %v71_v1 = vmul.f32 0.6931472, %v362_v61  ;;  %v286_v3 = vsub.f32 %v277_v63, %v285_v0 }
 0x1c9   :  { %v72_v5 = vadd.f32 %v71_v1, %v68_v4  ;;  %v287_v7 = vadd.f32 0.3, %v286_v3 }
 0x1cb   :  { %v75_v8 = vsub.f32 %v72_v5, %v74_v2  ;;  %v288_v9 = vmax.f32 %v287_v7, 0.0 }
 0x1cd   :  { %v78_v10 = vsub.f32 %v75_v8, %v77_v6  ;;  %v289_v11 = vrot.slane %v288_v9, 4 }
 0x1cf   :  { %v79_v12 = vsel %vm28_vm3, %v78_v10, 0.0  ;;  %v290_v13 = vadd.f32 %v289_v11, %v288_v9 }
 0x1d0   :  { %v80_v14 = vrot.slane %v79_v12, 4 }
 0x1d1   :  { %v291_v15 = vrot.slane %v290_v13, 2 }
 0x1d2   :  { %v81_v16 = vadd.f32 %v80_v14, %v79_v12 }
 0x1d3   :  { %v292_v17 = vadd.f32 %v291_v15, %v290_v13 }
 0x1d4   :  { %v82_v18 = vrot.slane %v81_v16, 2 }
 0x1d5   :  { %v293_v19 = vrot.slane %v292_v17, 1 }
 0x1d6   :  { %v83_v20 = vadd.f32 %v82_v18, %v81_v16 }
 0x1d7   :  { %v294_v21 = vadd.f32 %v293_v19, %v292_v17 }
 0x1d8   :  { %v84_v22 = vrot.slane %v83_v20, 1 }
 0x1d9   :  { %v295_v23 = vmul.f32 0.125, %v294_v21 }
 0x1da   :  { %v85_v24 = vadd.f32 %v84_v22, %v83_v20 }
 0x1db   :  { %296 = vst.msk [vmem:[#allocation7] sm:$0x1] %vm87_vm10, %v295_v23 }
 0x1dc   :  { %v86_v25 = vmul.f32 0.125, %v85_v24 }
 0x1dd   :  { %374 = shalt.err (!%p371_p4)
}
 0x1de   :  { %s375_s10 = scalar_lea.hbm %s528_s6, 16 }
 0x1df   :  { %p376_p5 = scmp.ne.s32.totalorder %s528_s6, %s375_s10  ;;  %p379_p6 = scmp.lt.u32.totalorder %s375_s10, %s528_s6 }
 0x1e1   :  { %p381_p7 = pnand %p379_p6, %p376_p5 }
 0x1e3   :  { %384 = shalt.err (!%p381_p7)
}
 0x1e4   :  { %316 = dma.vmem_to_hbm [thread:$0]  %s314_s27, 16, %s528_s6, [#allocation8]   ;;  %88 = vst.msk [vmem:[#allocation5] sm:$0x1] %vm87_vm10, %v86_v25 }
 0x1e5   :  { %s385_s17 = scalar_lea.vmem %s488_s29, 16  ;;  %s389_s18 = scalar_lea.vmem %s488_s29, 32 }
 0x1e6   :  { %p386_p8 = scmp.ne.s32.totalorder %s488_s29, %s385_s17  ;;  %p390_p9 = scmp.lt.s32.totalorder %s488_s29, %s488_s29 }
 0x1e7   :  { %p391_p10 = scmp.lt.s32.totalorder %s389_s18, %s385_s17 }
 0x1e9   :  { %p392_p11 = por %p391_p10, %p390_p9 }
 0x1eb   :  { %p393_p12 = pnand %p392_p11, %p386_p8 }
 0x1ed   :  { %396 = shalt.err (!%p393_p12)
}
 0x1ee   :  { %s397_s21 = scalar_lea.hbm %s527_s5, 16 }
 0x1ef   :  { %p398_p13 = scmp.ne.s32.totalorder %s527_s5, %s397_s21  ;;  %p401_p0 = scmp.lt.u32.totalorder %s397_s21, %s527_s5 }
 0x1f1   :  { %p403_p1 = pnand %p401_p0, %p398_p13 }
 0x1f3   :  { %406 = shalt.err (!%p403_p1)
}
 0x1f4   :  { %306 = dma.vmem_to_hbm [thread:$0]  %s488_s29, 16, %s527_s5, [#allocation6]  }
 0x1f5   :  { %407 = dma.done.wait [#allocation6], 16  }
 0x1f6   :  { %408 = vsyncadd [#allocation6], 4294967280 }
 0x1f7   :  { %409 = dma.done.wait [#allocation8], 16  }
 0x1f8   :  { %410 = vsyncadd [#allocation8], 4294967280 }
 0x1f9   :  { %323 = vsyncpa [#allocation6], 1 }
 0x1fa   :  { %324 = vsyncpa [#allocation8], 1 }

</bundles_post_ra>
